<compile_context>
chip_gen: v7x
topology: tpu7x:2x2x1
jax: 0.10.0
libtpu: 0.0.40
codegen_flags: <defaults>
</compile_context>

<pallas_src>
import jax
import jax.numpy as jnp
from jax.experimental import pallas as pl
from jax.experimental.pallas import tpu as pltpu

input_size = 784
hidden_size = 100
num_classes = 10


def _round_up(n, m):
    return pl.cdiv(n, m) * m


def ffn_kernel(x_ref, w1_ref, b1_ref, w2_ref, b2_ref, o_ref):
    # hidden = relu(x @ W1 + b1): bf16 MXU matmul, f32 accumulation,
    # bias + ReLU on the VPU in f32.
    h = jnp.dot(x_ref[...], w1_ref[...], preferred_element_type=jnp.float32)
    h = jnp.maximum(h + b1_ref[...], 0.0)          # b1 (1, Hp) broadcasts over rows
    # out = hidden @ W2 + b2: cast hidden to bf16 for the second MXU pass.
    out = jnp.dot(h.astype(jnp.bfloat16), w2_ref[...],
                  preferred_element_type=jnp.float32)
    o_ref[...] = (out + b2_ref[...]).astype(o_ref.dtype)


def ffn_forward(x, w1, b1, w2, b2, *, tile_b=256):
    """x: (B, input_size) f32.  w1: (K, H), b1: (H,)/(1,H), w2: (H, N), b2: (N,)/(1,N).
    Returns (B, num_classes) f32 = relu(x @ w1 + b1) @ w2 + b2."""
    B, K = x.shape
    H = w1.shape[1]
    N = w2.shape[1]

    # Lane-dense padded dims (multiples of 128); batch padded to the tile.
    Kp = _round_up(K, 128)
    Hp = _round_up(H, 128)
    Np = _round_up(N, 128)
    tb = min(tile_b, _round_up(B, 8))      # batch tile (sublane multiple)
    Bp = _round_up(B, tb)

    # Zero padding keeps the math exact:
    #   * zero K columns of x / zero K rows of w1 contribute nothing,
    #   * padded hidden lanes: relu(0 + 0) = 0, then multiply zero w2 rows,
    #   * padded output lanes: zero w2 columns + zero b2 lanes -> 0, sliced off.
    xp = jnp.zeros((Bp, Kp), jnp.bfloat16).at[:B, :K].set(x.astype(jnp.bfloat16))
    w1p = jnp.zeros((Kp, Hp), jnp.bfloat16).at[:K, :H].set(w1.astype(jnp.bfloat16))
    b1p = jnp.zeros((1, Hp), jnp.float32).at[:, :H].set(
        b1.reshape(1, H).astype(jnp.float32))
    w2p = jnp.zeros((Hp, Np), jnp.bfloat16).at[:H, :N].set(w2.astype(jnp.bfloat16))
    b2p = jnp.zeros((1, Np), jnp.float32).at[:, :N].set(
        b2.reshape(1, N).astype(jnp.float32))

    grid = (Bp // tb,)
    out_padded = pl.pallas_call(
        ffn_kernel,
        out_shape=jax.ShapeDtypeStruct((Bp, Np), jnp.float32),
        grid=grid,
        in_specs=[
            pl.BlockSpec((tb, Kp), lambda i: (i, 0)),    # x: tiled over batch
            pl.BlockSpec((Kp, Hp), lambda i: (0, 0)),    # W1: resident across steps
            pl.BlockSpec((1, Hp), lambda i: (0, 0)),     # b1: resident
            pl.BlockSpec((Hp, Np), lambda i: (0, 0)),    # W2: resident
            pl.BlockSpec((1, Np), lambda i: (0, 0)),     # b2: resident
        ],
        out_specs=pl.BlockSpec((tb, Np), lambda i: (i, 0)),
        compiler_params=pltpu.CompilerParams(
            dimension_semantics=("parallel",),           # megacore / v7x 2-TC sharding
            vmem_limit_bytes=32 * 1024 * 1024,           # safe on v7x's 64 MiB VMEM
        ),
    )(xp, w1p, b1p, w2p, b2p)

    return out_padded[:B, :N]


if __name__ == "__main__":
    key = jax.random.PRNGKey(0)
    k_x, k_w1, k_b1, k_w2, k_b2 = jax.random.split(key, 5)

    batch = 50  # non-multiple of tile -> exercises batch padding + 2-step grid

    # Deterministic parameter init (PyTorch-style uniform bounds, synthetic).
    bound1 = 1.0 / (input_size ** 0.5)
    bound2 = 1.0 / (hidden_size ** 0.5)
    w1 = jax.random.uniform(k_w1, (input_size, hidden_size),
                            minval=-bound1, maxval=bound1, dtype=jnp.float32)
    b1 = jax.random.uniform(k_b1, (1, hidden_size),
                            minval=-bound1, maxval=bound1, dtype=jnp.float32)
    w2 = jax.random.uniform(k_w2, (hidden_size, num_classes),
                            minval=-bound2, maxval=bound2, dtype=jnp.float32)
    b2 = jax.random.uniform(k_b2, (1, num_classes),
                            minval=-bound2, maxval=bound2, dtype=jnp.float32)

    x = jax.random.normal(k_x, (batch, input_size), dtype=jnp.float32)

    out = ffn_forward(x, w1, b1, w2, b2, tile_b=32)
    jax.block_until_ready(out)
    assert out.shape == (batch, num_classes)

    # Reference in plain JAX mirroring the kernel's bf16-input / f32-accumulate
    # numerics (products are exact in f32; only summation order differs).
    def bf(a):
        return a.astype(jnp.bfloat16).astype(jnp.float32)

    ref_h = jnp.maximum(bf(x) @ bf(w1) + b1, 0.0)
    ref = bf(ref_h) @ bf(w2) + b2
    assert jnp.allclose(out, ref, atol=2e-3, rtol=2e-3)

    # Loose sanity check against the full-f32 math of the original module.
    ref_f32 = jnp.maximum(x @ w1 + b1, 0.0) @ w2 + b2
    assert jnp.allclose(out, ref_f32, atol=5e-2, rtol=5e-2)

    print("KERNEL_OK")
</pallas_src>

<mosaic_0001>
module attributes {stable_mosaic.version = 11 : i64} {
  func.func @ffn_kernel(%arg0: i32, %arg1: memref<32x896xbf16, #tpu.memory_space<vmem>>, %arg2: memref<896x128xbf16, #tpu.memory_space<vmem>>, %arg3: memref<1x128xf32, #tpu.memory_space<vmem>>, %arg4: memref<128x128xbf16, #tpu.memory_space<vmem>>, %arg5: memref<1x128xf32, #tpu.memory_space<vmem>>, %arg6: memref<32x128xf32, #tpu.memory_space<vmem>>) attributes {dimension_semantics = [#tpu.dimension_semantics<parallel>], iteration_bounds = array<i64: 2>, scalar_prefetch = 0 : i64, scratch_operands = 0 : i64, tpu.core_type = #tpu.core_type<tc>, window_params = [{transform_indices = @transform_0, window_bounds = array<i64: 32, 896>}, {pipeline_mode = #tpu.pipeline_mode<synchronous>, transform_indices = @transform_1, window_bounds = array<i64: 896, 128>}, {pipeline_mode = #tpu.pipeline_mode<synchronous>, transform_indices = @transform_2, window_bounds = array<i64: 1, 128>}, {pipeline_mode = #tpu.pipeline_mode<synchronous>, transform_indices = @transform_3, window_bounds = array<i64: 128, 128>}, {pipeline_mode = #tpu.pipeline_mode<synchronous>, transform_indices = @transform_4, window_bounds = array<i64: 1, 128>}, {transform_indices = @transform_5, window_bounds = array<i64: 32, 128>}]} {
    %c0 = arith.constant 0 : index
    %c0_0 = arith.constant 0 : index
    %0 = vector.load %arg1[%c0, %c0_0] : memref<32x896xbf16, #tpu.memory_space<vmem>>, vector<32x896xbf16>
    %c0_1 = arith.constant 0 : index
    %c0_2 = arith.constant 0 : index
    %1 = vector.load %arg2[%c0_1, %c0_2] : memref<896x128xbf16, #tpu.memory_space<vmem>>, vector<896x128xbf16>
    %cst = arith.constant dense<0.000000e+00> : vector<32x128xf32>
    %2 = tpu.matmul %0, %1, %cst {dimension_numbers = #tpu.dot_dimension_numbers<[1], [0], [0], [1], [0, 0, 1, 1], [], []>} : vector<32x896xbf16>, vector<896x128xbf16>, vector<32x128xf32> -> vector<32x128xf32>
    %c0_3 = arith.constant 0 : index
    %c0_4 = arith.constant 0 : index
    %3 = vector.load %arg3[%c0_3, %c0_4] : memref<1x128xf32, #tpu.memory_space<vmem>>, vector<1x128xf32>
    %4 = vector.broadcast %3 : vector<1x128xf32> to vector<32x128xf32>
    %5 = arith.addf %2, %4 : vector<32x128xf32>
    %cst_5 = arith.constant 0.000000e+00 : f32
    %6 = vector.broadcast %cst_5 : f32 to vector<32x128xf32>
    %7 = arith.maximumf %5, %6 : vector<32x128xf32>
    %8 = arith.truncf %7 : vector<32x128xf32> to vector<32x128xbf16>
    %c0_6 = arith.constant 0 : index
    %c0_7 = arith.constant 0 : index
    %9 = vector.load %arg4[%c0_6, %c0_7] : memref<128x128xbf16, #tpu.memory_space<vmem>>, vector<128x128xbf16>
    %cst_8 = arith.constant dense<0.000000e+00> : vector<32x128xf32>
    %10 = tpu.matmul %8, %9, %cst_8 {dimension_numbers = #tpu.dot_dimension_numbers<[1], [0], [0], [1], [0, 0, 1, 1], [], []>} : vector<32x128xbf16>, vector<128x128xbf16>, vector<32x128xf32> -> vector<32x128xf32>
    %c0_9 = arith.constant 0 : index
    %c0_10 = arith.constant 0 : index
    %11 = vector.load %arg5[%c0_9, %c0_10] : memref<1x128xf32, #tpu.memory_space<vmem>>, vector<1x128xf32>
    %12 = vector.broadcast %11 : vector<1x128xf32> to vector<32x128xf32>
    %13 = arith.addf %10, %12 : vector<32x128xf32>
    %c0_11 = arith.constant 0 : index
    %c0_12 = arith.constant 0 : index
    %14 = vector.load %arg6[%c0_11, %c0_12] : memref<32x128xf32, #tpu.memory_space<vmem>>, vector<32x128xf32>
    tpu.vector_store %arg6[%c0_11, %c0_12], %13 {strides = array<i32>} : memref<32x128xf32, #tpu.memory_space<vmem>>, vector<32x128xf32>,
    return
  }
  func.func @transform_0(%arg0: i32) -> (i32, i32) {
    %c0_i32 = arith.constant 0 : i32
    %c0_i32_0 = arith.constant 0 : i32
    return %arg0, %c0_i32 : i32, i32
  }
  func.func @transform_1(%arg0: i32) -> (i32, i32) {
    %c0_i32 = arith.constant 0 : i32
    %c0_i32_0 = arith.constant 0 : i32
    %c0_i32_1 = arith.constant 0 : i32
    return %c0_i32, %c0_i32_0 : i32, i32
  }
  func.func @transform_2(%arg0: i32) -> (i32, i32) {
    %c0_i32 = arith.constant 0 : i32
    %c0_i32_0 = arith.constant 0 : i32
    %c0_i32_1 = arith.constant 0 : i32
    return %c0_i32, %c0_i32_0 : i32, i32
  }
  func.func @transform_3(%arg0: i32) -> (i32, i32) {
    %c0_i32 = arith.constant 0 : i32
    %c0_i32_0 = arith.constant 0 : i32
    %c0_i32_1 = arith.constant 0 : i32
    return %c0_i32, %c0_i32_0 : i32, i32
  }
  func.func @transform_4(%arg0: i32) -> (i32, i32) {
    %c0_i32 = arith.constant 0 : i32
    %c0_i32_0 = arith.constant 0 : i32
    %c0_i32_1 = arith.constant 0 : i32
    return %c0_i32, %c0_i32_0 : i32, i32
  }
  func.func @transform_5(%arg0: i32) -> (i32, i32) {
    %c0_i32 = arith.constant 0 : i32
    %c0_i32_0 = arith.constant 0 : i32
    return %arg0, %c0_i32 : i32, i32
  }
}

</mosaic_0001>

<bundles_post_ra>
// kernel: tpu_custom_call.1
= control target key start
LH: loop header
LB: loop body
LE: loop exit
PB: predicated region body
PF: predicated region fallthrough
CT: control target
= control target key end

     0   :  { %10 = vsyncpa [#allocation3], 0  ;;  %s2108_s0 = inlined_call_operand.hbm [shape: bf16[64,896], index: 0, kind: input, shape index: {}]   ;;  %s2109_s1 = inlined_call_operand.hbm [shape: bf16[896,128], index: 1, kind: input, shape index: {}]   ;;  %s2110_s2 = inlined_call_operand.vmem [shape: f32[1,128], index: 2, kind: input, shape index: {}]   ;;  %s2111_s3 = inlined_call_operand.hbm [shape: bf16[128,128], index: 3, kind: input, shape index: {}]   ;;  %s2112_s4 = inlined_call_operand.vmem [shape: f32[1,128], index: 4, kind: input, shape index: {}]   ;;  %s2113_s5 = inlined_call_operand.hbm [shape: f32[64,128], index: 5, kind: output, shape index: {}]  }
   0x1   :  { %12 = vsyncpa [#allocation3 + $0x1], 0 }
   0x2   :  { %13 = vsyncpa [#allocation6], 0 }
   0x3   :  { %14 = vsyncpa [#allocation4], 0 }
   0x4   :  { %16 = vsyncpa [#allocation4 + $0x1], 0  ;;  %s1851_s18 = smov 0   ;;  %s1853_s19 = smov 0  }
   0x5   :  { %s1855_s20 = smov 0   ;;  %s1857_s21 = smov 0  }
   0x6 LB: > { %s1872_s22 = sadd.s32 4294967295, %s1809_s21   ;;  %s1251_s23 = sadd.s32 4294967294, %s1809_s21   ;;  %s1809_s21 = sphi %s1857_s21, %s2133_s21   ;;  %s1805_s20 = sphi %s1855_s20, %s2132_s20   ;;  %s1801_s19 = sphi %s1853_s19, %s2131_s19   ;;  %s1797_s18 = sphi %s1851_s18, %s2130_s18  }
   0x7   : > { %p42_p0 = scmp.ne.s32.totalorder %s1801_s19, %s1797_s18  ;;  %p2114_p1 = scmp.eq.s32.totalorder %s1872_s22, 0 }
   0x8   : > { %p156_p3 = scmp.eq.s32.totalorder %s1251_s23, 1  ;;  %p1252_p5 = scmp.ge.s32.totalorder %s1809_s21, 1 }
   0x9   : > { %p1881_p4 = por %p2114_p1, %p42_p0  ;;  %p163_p7 = scmp.lt.s32.totalorder %s1809_s21, 3 }
   0xa   : > { %p1886_p6 = por %p156_p3, %p42_p0  ;;  %s1811_s27 = smov [#allocation5]  }
   0xb   : > { %s2117_s24 = scalar_select %p1881_p4, 1, 0 }
   0xc   : > { %s2118_s25 = scalar_select %p1886_p6, 1, 0 }
   0xd   : > { %p1891_p8 = pnand %p1252_p5, %p163_p7  ;;  %s175_s28 = sshll.u32 %s1811_s27, 4  ;;  %s1895_s28 = int_to_ptr.vmem [resolvable:$true] %s175_s28 }
   0xe   : > { %s1812_s30 = smov [#allocation7]   ;;  %s1653_s9 = scalar_lea.hbm %s2109_s1, 7168 }
   0xf   : > { %p1508_p9 = pneg %p1891_p8  ;;  %s191_s6 = sshll.u32 %s1812_s30, 4  ;;  %s1906_s6 = int_to_ptr.vmem [resolvable:$true] %s191_s6 }
  0x10   : > { %p1654_p12 = scmp.ne.s32.totalorder %s2109_s1, %s1653_s9  ;;  %p1660_p5 = scmp.lt.u32.totalorder %s1653_s9, %s2109_s1 }
  0x11   : > { %p1902_p11 = pnand %p1508_p9, %p2114_p1 }
  0x13   : > { %p1655_p13 = pneg %p1902_p11 }
  0x15   : > { %p1656_p0 = pnand %p1655_p13, %p1654_p12 }
  0x17   : > { %p1657_p3 = pneg %p1656_p0 }
  0x19   : > { %p1662_p7 = pnand %p1660_p5, %p1657_p3 }
  0x1b   : > { %1665 = shalt.err (!%p1662_p7)
}
  0x1c   : > { %s1666_s14 = scalar_lea.vmem %s1895_s28, 7168  ;;  %p1674_p2 = scmp.lt.s32.totalorder %s1895_s28, %s1895_s28 }
  0x1d   : > { %p1667_p9 = scmp.ne.s32.totalorder %s1895_s28, %s1666_s14  ;;  %p1675_p12 = scmp.lt.s32.totalorder %s1666_s14, %s1666_s14 }
  0x1f   : > { %p1669_p10 = pnand %p1667_p9, %p1655_p13  ;;  %p1676_p0 = por %p1675_p12, %p1674_p2 }
  0x21   : > { %p1670_p1 = pneg %p1669_p10 }
  0x23   : > { %p1677_p6 = pnand %p1676_p0, %p1670_p1 }
  0x25   : > { %1680 = shalt.err (!%p1677_p6)
}
  0x26   : > { %s1813_s15 = smov 64   ;;  %s1814_s16 = smov 4  }
  0x27   : > { %1511 = dma.hbm_to_vmem [thread:$0]  (!%p1902_p11), %s2109_s1, 7168, %s1895_s28, [#allocation6], %s1813_s15, %s1813_s15, %s1814_s16  }
  0x28   : > { %s1681_s7 = scalar_lea.hbm %s2111_s3, 1024 }
  0x29   : > { %p1682_p2 = scmp.ne.s32.totalorder %s2111_s3, %s1681_s7  ;;  %p1688_p10 = scmp.lt.u32.totalorder %s1681_s7, %s2111_s3 }
  0x2b   : > { %p1684_p1 = pnand %p1682_p2, %p1655_p13 }
  0x2d   : > { %p1685_p6 = pneg %p1684_p1 }
  0x2f   : > { %p1690_p3 = pnand %p1688_p10, %p1685_p6 }
  0x31   : > { %1693 = shalt.err (!%p1690_p3)
}
  0x32   : > { %s1694_s28 = scalar_lea.vmem %s1906_s6, 1024  ;;  %p1702_p12 = scmp.lt.s32.totalorder %s1906_s6, %s1906_s6 }
  0x33   : > { %p1695_p5 = scmp.ne.s32.totalorder %s1906_s6, %s1694_s28  ;;  %p1703_p0 = scmp.lt.s32.totalorder %s1694_s28, %s1694_s28 }
  0x35   : > { %p1697_p7 = pnand %p1695_p5, %p1655_p13  ;;  %p1704_p2 = por %p1703_p0, %p1702_p12 }
  0x37   : > { %p1698_p9 = pneg %p1697_p7 }
  0x39   : > { %p1705_p1 = pnand %p1704_p2, %p1698_p9 }
  0x3b   : > { %1708 = shalt.err (!%p1705_p1)
}
  0x3c   : > { %1514 = dma.hbm_to_vmem [thread:$0]  (!%p1902_p11), %s2111_s3, 1024, %s1906_s6, [#allocation6], %s1813_s15, %s1813_s15, %s1814_s16  }
  0x3d   : > { %s1961_s14 = sadd.s32 1, %s1809_s21   ;;  %s29_s29 = sadd.s32 1, %s1805_s20 }
  0x3e   : > { %s26_s17 = ssub.s32 %s1809_s21, %s1961_s14  ;;  %p36_p13 = scmp.ne.s32.totalorder %s1805_s20, %s1801_s19 }
  0x3f   : > { %p27_p6 = scmp.eq.s32.totalorder %s26_s17, 0  ;;  %p37_p10 = scmp.eq.s32.totalorder %s1809_s21, 0 }
  0x40   : > { %p2121_p3 = scmp.eq.s32.totalorder %s1872_s22, 1  ;;  %p1525_p7 = scmp.lt.s32.totalorder %s1809_s21, 2 }
  0x41   : > { %s1977_s27 = scalar_select %p27_p6, %s1805_s20, %s29_s29  }
  0x42   : > { %p1971_p5 = por %p2121_p3, %p36_p13  ;;  %p38_p9 = por %p37_p10, %p36_p13 }
  0x43   : > { %s208_s30 = sand.u32 1, %s1805_s20   ;;  %s1494_s6 = smul.u32 1792, %s1809_s21 }
  0x44   : > { %s2122_s23 = scalar_select %p1971_p5, 1, 0 }
  0x45   : > { %s1493_s7 = smul.u32 112, %s208_s30  ;;  %p1981_p11 = pnand %p1525_p7, %p38_p9 }
  0x46   : > { %s1988_s9 = scalar_lea.hbm %s2108_s0, %s1494_s6  ;;  %s1992_s28 = scalar_lea.sflag [#allocation3], %s208_s30 }
  0x47   : > { %s212_s10 = scalar_lea.vmem [#allocation2], %s1493_s7  ;;  %s1709_s12 = scalar_lea.hbm %s1988_s9, 1792 }
  0x48   : > { %s220_s11 = sshll.u32 %s212_s10, 4  ;;  %p1710_p12 = scmp.ne.s32.totalorder %s1988_s9, %s1709_s12  ;;  %s1990_s11 = int_to_ptr.vmem [resolvable:$true] %s220_s11 }
  0x49   : > { %p1711_p0 = pneg %p1981_p11  ;;  %s1714_s17 = scalar_lea.hbm %s2108_s0, 3584 }
  0x4a   : > { %p1715_p13 = scmp.lt.u32.totalorder %s1988_s9, %s2108_s0  ;;  %p1716_p6 = scmp.lt.u32.totalorder %s1714_s17, %s1709_s12 }
  0x4b   : > { %p1712_p2 = pnand %p1711_p0, %p1710_p12  ;;  %p1718_p3 = scmp.lt.u32.totalorder %s1709_s12, %s1988_s9 }
  0x4c   : > { %p1717_p10 = por %p1716_p6, %p1715_p13 }
  0x4d   : > { %p1713_p1 = pneg %p1712_p2 }
  0x4e   : > { %p1719_p7 = por %p1718_p3, %p1717_p10 }
  0x50   : > { %p1720_p9 = pnand %p1719_p7, %p1713_p1 }
  0x52   : > { %1723 = shalt.err (!%p1720_p9)
}
  0x53   : > { %s1724_s30 = scalar_lea.vmem %s1990_s11, 1792  ;;  %s1815_s7 = smov [#allocation2]  }
  0x54   : > { %p1725_p12 = scmp.ne.s32.totalorder %s1990_s11, %s1724_s30  ;;  %s1729_s8 = sshll.u32 %s1815_s7, 4  ;;  %s1730_s8 = int_to_ptr.vmem [resolvable:$false] %s1729_s8 }
  0x55   : > { %s1731_s10 = scalar_lea.vmem %s1730_s8, 3584  ;;  %p1732_p4 = scmp.lt.s32.totalorder %s1990_s11, %s1730_s8 }
  0x56   : > { %p1727_p2 = pnand %p1725_p12, %p1711_p0  ;;  %p1733_p13 = scmp.lt.s32.totalorder %s1731_s10, %s1724_s30 }
  0x58   : > { %p1728_p5 = pneg %p1727_p2  ;;  %p1734_p6 = por %p1733_p13, %p1732_p4 }
  0x5a   : > { %p1735_p10 = pnand %p1734_p6, %p1728_p5 }
  0x5c   : > { %1738 = shalt.err (!%p1735_p10)
}
  0x5d   : > { %s1816_s12 = smov 448   ;;  %s1817_s13 = smov 28  }
  0x5e   : > { %1518 = dma.hbm_to_vmem [thread:$0]  (!%p1981_p11), %s1988_s9, 1792, %s1990_s11, %s1992_s28, %s1816_s12, %s1816_s12, %s1817_s13  }
  0x5f   : > { %232 = sbr.rel (%p1891_p8) target bundleno = 636 (0x27c), region = 40  ;;  %s2023_s29 = sand.u32 (!%p1891_p8), 1, %s1801_s19  }
  0x60   : > { %s1495_s17 = smul.u32 (!%p1891_p8), 112, %s2023_s29  ;;  %s235_s6 = scalar_lea.sflag (!%p1891_p8), [#allocation3], %s2023_s29 }
  0x61   : > { %p2124_p4 = scmp.ne.s32.totalorder (!%p1891_p8), %s2117_s24, 0 }
  0x62   : > { %s2027_s16 = scalar_lea.vmem (!%p1891_p8), [#allocation2], %s1495_s17 }
  0x66   : > { %1784 = dma.done.wait (%p2124_p4), %s235_s6, 1792  }
  0x67   : > { %1786 = vsyncadd (%p2124_p4), %s235_s6, 4294965504  ;;  %p2125_p5 = scmp.eq.s32.totalorder %s1872_s22, 0 }
  0x69   : > { %1788 = dma.done.wait (%p2125_p5), [#allocation6], 8192   ;;  %p2126_p8 = pmov %p2125_p5 }
  0x6a   : > { %v1569_v0 = vld [vmem:[#allocation5 + $0x40] sm:$0xff]   ;;  %v1573_v4 = vld [vmem:[#allocation5 + $0x48] sm:$0xff]   ;;  %v1577_v8 = vld [vmem:[#allocation5 + $0x50] sm:$0xff]   ;;  %s1262_s15 = sshll.u32 %s2023_s29, 5  ;;  %s1348_s7 = sshll.u32 %s1872_s22, 9 }
  0x6b   : > { %1790 = vsyncadd (%p2126_p8), [#allocation6], 4294959104  ;;  %v1570_v1 = vld [vmem:[#allocation5] sm:$0xff]   ;;  %1349 = vmatprep.subr.bf16.mxu0 %v1569_v0  ;;  %v1574_v5 = vld [vmem:[#allocation5 + $0x8] sm:$0xff]   ;;  %s272_s28 = scalar_lea.vmem [#allocation8], %s1262_s15  ;;  %s2064_s12 = scalar_lea.hbm %s2113_s5, %s1348_s7 }
  0x6c   : > { %v1571_v2 = vld [vmem:[#allocation5 + $0xc0] sm:$0xff]   ;;  %1350 = vmatpush3.bf16.msra.mxu0 %v1570_v1  ;;  %v1575_v6 = vld [vmem:[#allocation5 + $0xc8] sm:$0xff]   ;;  %v1578_v9 = vld [vmem:[#allocation5 + $0x10] sm:$0xff]   ;;  %s1159_s30 = sshll.u32 %s272_s28, 4  ;;  %s1146_s22 = scalar_lea.sflag [#allocation4], %s2023_s29  ;;  %s2059_s30 = int_to_ptr.vmem [resolvable:$true] %s1159_s30 }
  0x6d   : > { %v1572_v3 = vld [vmem:[#allocation5 + $0x80] sm:$0xff]   ;;  %1377 = vmatprep.subr.bf16.mxu1 %v1571_v2  ;;  %1351 = vmatprep.subr.bf16.mxu0 %v1573_v4  ;;  %v1576_v7 = vld [vmem:[#allocation5 + $0x88] sm:$0xff]   ;;  %v1579_v10 = vld [vmem:[#allocation5 + $0xd0] sm:$0xff]   ;;  %s1739_s13 = scalar_lea.vmem %s2059_s30, 512  ;;  %p2127_p0 = scmp.ne.s32.totalorder %s2122_s23, 0 }
  0x6e   : > { %1378 = vmatpush3.bf16.msra.mxu1 %v1572_v3  ;;  %v1580_v11 = vld [vmem:[#allocation5 + $0x90] sm:$0xff]   ;;  %v1581_v12 = vld [vmem:[#allocation5 + $0x58] sm:$0xff]   ;;  %v1585_v16 = vld [vmem:[#allocation5 + $0x60] sm:$0xff]   ;;  %p1740_p11 = scmp.ne.s32.totalorder %s2059_s30, %s1739_s13  ;;  %s1818_s17 = smov [#allocation8]  }
  0x6f   : > { %1379 = vmatprep.subr.bf16.mxu1 %v1575_v6  ;;  %v1582_v13 = vld [vmem:[#allocation5 + $0x18] sm:$0xff]   ;;  %v1586_v17 = vld [vmem:[#allocation5 + $0x20] sm:$0xff]   ;;  %v1589_v20 = vld [vmem:[#allocation5 + $0x68] sm:$0xff]   ;;  %s1743_s6 = sshll.u32 %s1818_s17, 4  ;;  %s1744_s6 = int_to_ptr.vmem [resolvable:$false] %s1743_s6 }
  0x70   : > { %1352 = vmatpush3.bf16.msra.mxu0 %v1574_v5  ;;  %v1583_v14 = vld [vmem:[#allocation5 + $0xd8] sm:$0xff]   ;;  %v1587_v18 = vld [vmem:[#allocation5 + $0xe0] sm:$0xff]   ;;  %v1590_v21 = vld [vmem:[#allocation5 + $0x28] sm:$0xff]   ;;  %p1741_p1 = pnand %p1740_p11, %p2127_p0  ;;  %p1746_p7 = scmp.lt.s32.totalorder %s2059_s30, %s1744_s6 }
  0x71   : > { %1353 = vmatprep.subr.bf16.mxu0 %v1577_v8  ;;  %v1584_v15 = vld [vmem:[#allocation5 + $0x98] sm:$0xff]   ;;  %v1588_v19 = vld [vmem:[#allocation5 + $0xa0] sm:$0xff]   ;;  %v1591_v22 = vld [vmem:[#allocation5 + $0xe8] sm:$0xff]  }
  0x72   : > { %1380 = vmatpush3.bf16.msra.mxu1 %v1576_v7  ;;  %v1592_v23 = vld [vmem:[#allocation5 + $0xa8] sm:$0xff]   ;;  %v1593_v24 = vld [vmem:[#allocation5 + $0x70] sm:$0xff]   ;;  %v1597_v28 = vld [vmem:[#allocation5 + $0x78] sm:$0xff]   ;;  %p1742_p3 = pneg %p1741_p1 }
  0x73   : > { %1381 = vmatprep.subr.bf16.mxu1 %v1579_v10  ;;  %v1594_v25 = vld [vmem:[#allocation5 + $0x30] sm:$0xff]   ;;  %v1598_v29 = vld [vmem:[#allocation5 + $0x38] sm:$0xff]   ;;  %v1604_v34 = vld [vmem:[#allocation5 + $0x140] sm:$0xff]  }
  0x74   : > { %1354 = vmatpush3.bf16.msra.mxu0 %v1578_v9  ;;  %v1595_v26 = vld [vmem:[#allocation5 + $0xf0] sm:$0xff]   ;;  %v1599_v30 = vld [vmem:[#allocation5 + $0xf8] sm:$0xff]   ;;  %v1608_v37 = vld [vmem:[#allocation5 + $0x100] sm:$0xff]  }
  0x75   : > { %1355 = vmatprep.subr.bf16.mxu0 %v1581_v12  ;;  %v1596_v27 = vld [vmem:[#allocation5 + $0xb0] sm:$0xff]   ;;  %v1603_v33 = vld [vmem:[#allocation5 + $0xb8] sm:$0xff]   ;;  %v1609_v38 = vld [vmem:[#allocation5 + $0x148] sm:$0xff]  }
  0x76   : > { %1382 = vmatpush3.bf16.msra.mxu1 %v1580_v11  ;;  %v1600_v31 = vld [vmem:[%s2027_s16] ss:$28 sps:$4 sm:$0xff]   ;;  %v1605_v35 = vld [vmem:[%s2027_s16 + $0x8] ss:$28 sps:$4 sm:$0xff]   ;;  %v1625_v53 = vld [vmem:[%s2027_s16 + $0x38] ss:$28 sps:$4 sm:$0xff]  }
  0x77   : > { %1383 = vmatprep.subr.bf16.mxu1 %v1583_v14  ;;  %v1602_v32 = vld [vmem:[%s2027_s16 + $0x4] ss:$28 sps:$4 sm:$0xff]   ;;  %v1607_v36 = vld [vmem:[%s2027_s16 + $0xc] ss:$28 sps:$4 sm:$0xff]   ;;  %v1621_v50 = vld [vmem:[%s2027_s16 + $0x3c] ss:$28 sps:$4 sm:$0xff]  }
  0x78   : > { %1356 = vmatpush3.bf16.msra.mxu0 %v1582_v13  ;;  %851 = vmatprep.mubr.bf16.mxu0 %v1602_v32  ;;  %v1610_v39 = vld [vmem:[#allocation5 + $0x180] sm:$0xff]   ;;  %v1611_v40 = vld [vmem:[#allocation5 + $0x108] sm:$0xff]   ;;  %v1612_v41 = vld [vmem:[#allocation5 + $0x150] sm:$0xff]  }
  0x79   : > { %1357 = vmatprep.subr.bf16.mxu0 %v1585_v16  ;;  %900 = vmatprep.mubr.bf16.mxu1 %v1607_v36  ;;  %v1613_v42 = vld [vmem:[#allocation5 + $0x188] sm:$0xff]   ;;  %v1614_v43 = vld [vmem:[#allocation5 + $0x110] sm:$0xff]   ;;  %v1615_v44 = vld [vmem:[#allocation5 + $0x158] sm:$0xff]  }
  0x7a   : > { %1384 = vmatpush3.bf16.msra.mxu1 %v1584_v15  ;;  %v1616_v45 = vld [vmem:[#allocation5 + $0x190] sm:$0xff]   ;;  %v1617_v46 = vld [vmem:[#allocation5 + $0x118] sm:$0xff]   ;;  %v1618_v47 = vld [vmem:[#allocation5 + $0x160] sm:$0xff]  }
  0x7b   : > { %1385 = vmatprep.subr.bf16.mxu1 %v1587_v18  ;;  %v1619_v48 = vld [vmem:[#allocation5 + $0x198] sm:$0xff]   ;;  %v1620_v49 = vld [vmem:[#allocation5 + $0x120] sm:$0xff]   ;;  %v1623_v51 = vld [vmem:[#allocation5 + $0x168] sm:$0xff]  }
  0x7c   : > { %1358 = vmatpush3.bf16.msra.mxu0 %v1586_v17  ;;  %v1624_v52 = vld [vmem:[#allocation5 + $0x1a0] sm:$0xff]   ;;  %v1626_v54 = vld [vmem:[#allocation5 + $0x128] sm:$0xff]   ;;  %v1630_v57 = vld [vmem:[#allocation5 + $0x170] sm:$0xff]  }
  0x7d   : > { %1359 = vmatprep.subr.bf16.mxu0 %v1589_v20  ;;  %v1627_v55 = vld [vmem:[%s2027_s16 + $0x44] ss:$28 sps:$4 sm:$0xff]   ;;  %v1631_v58 = vld [vmem:[#allocation5 + $0x1a8] sm:$0xff]   ;;  %v1633_v60 = vld [vmem:[#allocation5 + $0x178] sm:$0xff]  }
  0x7e   : > { %1386 = vmatpush3.bf16.msra.mxu1 %v1588_v19  ;;  %v1629_v56 = vld [vmem:[%s2027_s16 + $0x40] ss:$28 sps:$4 sm:$0xff]   ;;  %v1638_v63 = vld [vmem:[%s2027_s16 + $0x14] ss:$28 sps:$4 sm:$0xff]   ;;  %v1642_v3 = vld [vmem:[%s2027_s16 + $0x4c] ss:$28 sps:$4 sm:$0xff]  }
  0x7f   : > { %1387 = vmatprep.subr.bf16.mxu1 %v1591_v22  ;;  %v1632_v59 = vld [vmem:[#allocation5 + $0x130] sm:$0xff]   ;;  %v1635_v62 = vld [vmem:[#allocation5 + $0x138] sm:$0xff]   ;;  %v1645_v6 = vld [vmem:[#allocation7] sm:$0xff]  }
  0x80   : > { %1360 = vmatpush3.bf16.msra.mxu0 %v1590_v21  ;;  %v1634_v61 = vld [vmem:[#allocation5 + $0x1b0] sm:$0xff]   ;;  %v1639_v0 = vld [vmem:[#allocation5 + $0x1b8] sm:$0xff]   ;;  %v1646_v7 = vld [vmem:[#allocation7 + $0x8] sm:$0xff]  }
  0x81   : > { %1361 = vmatprep.subr.bf16.mxu0 %v1593_v24  ;;  %v1640_v1 = vld [vmem:[%s2027_s16 + $0x18] ss:$28 sps:$4 sm:$0xff]   ;;  %v1636_v2 = vld [vmem:[%s2027_s16 + $0x10] ss:$28 sps:$4 sm:$0xff]   ;;  %v1644_v5 = vld [vmem:[%s2027_s16 + $0x48] ss:$28 sps:$4 sm:$0xff]  }
  0x82   : > { %1388 = vmatpush3.bf16.msra.mxu1 %v1592_v23  ;;  %v1641_v4 = vld [vmem:[%s2027_s16 + $0x50] ss:$28 sps:$4 sm:$0xff]   ;;  %s1745_s16 = scalar_lea.vmem %s1744_s6, 1024 }
  0x83   : > { %1389 = vmatprep.subr.bf16.mxu1 %v1595_v26  ;;  %v1647_v8 = vld [vmem:[#allocation7 + $0x10] sm:$0xff]   ;;  %v1648_v9 = vld [vmem:[#allocation7 + $0x18] sm:$0xff]   ;;  %v1649_v10 = vld [vmem:[#allocation7 + $0x20] sm:$0xff]   ;;  %p1747_p9 = scmp.lt.s32.totalorder %s1745_s16, %s1739_s13 }
  0x84   : > { %1362 = vmatpush3.bf16.msra.mxu0 %v1594_v25  ;;  %v1650_v11 = vld [vmem:[#allocation7 + $0x28] sm:$0xff]   ;;  %v1651_v12 = vld [vmem:[#allocation7 + $0x30] sm:$0xff]   ;;  %v1652_v13 = vld [vmem:[#allocation7 + $0x38] sm:$0xff]  }
  0x85   : > { %1363 = vmatprep.subr.bf16.mxu0 %v1597_v28  ;;  %v1263_v15 = vld [vmem:[%s2110_s2] ss:$0 sm:$0xff]  ;;  %p1748_p12 = por %p1747_p9, %p1746_p7 }
  0x86   : > { %1390 = vmatpush3.bf16.msra.mxu1 %v1596_v27 }
  0x87   : > { %1391 = vmatprep.subr.bf16.mxu1 %v1599_v30  ;;  %p1749_p2 = pnand %p1748_p12, %p1742_p3 }
  0x88   : > { %1364 = vmatpush3.bf16.msra.mxu0 %v1598_v29 }
  0x89   : > { %1405 = vmatprep.subr.bf16.mxu0 %v1604_v34 }
  0x8a   : > { %1392 = vmatpush3.bf16.msra.mxu1 %v1603_v33 }
  0x8b   : > { %852 = vmatmul.mubr.bf16.vlgmr.msra.gmra.mrb[0].mxu0 %v1600_v31  ;;  %1453 = vmatprep.subr.bf16.mxu1 %v1610_v39 }
  0x8c   : > { %1406 = vmatpush3.bf16.msra.mxu0 %v1608_v37  ;;  %859 = vmatprep.mubr.bf16.mxu0 %v1621_v50 }
  0x8d   : > { %901 = vmatmul.mubr.bf16.vlgmr.msra.gmra.mrb[0].mxu1 %v1605_v35  ;;  %1407 = vmatprep.subr.bf16.mxu0 %v1609_v38 }
  0x8e   : > { %1454 = vmatpush3.bf16.msra.mxu1 %v1610_v39  ;;  %908 = vmatprep.mubr.bf16.mxu1 %v1627_v55 }
  0x8f   : > { %1455 = vmatprep.subr.bf16.mxu1 %v1613_v42 }
  0x90   : > { %1408 = vmatpush3.bf16.msra.mxu0 %v1611_v40 }
  0x91   : > { %1409 = vmatprep.subr.bf16.mxu0 %v1612_v41 }
  0x92   : > { %1456 = vmatpush3.bf16.msra.mxu1 %v1613_v42 }
  0x93   : > { %1457 = vmatprep.subr.bf16.mxu1 %v1616_v45  ;;  %860 = vmatmul.mubr.bf16.gmra.mrb[4].mxu0 %v1625_v53 }
  0x94   : > { %1410 = vmatpush3.bf16.msra.mxu0 %v1614_v43  ;;  %949 = vmatprep.mubr.bf16.mxu0 %v1638_v63 }
  0x95   : > { %1411 = vmatprep.subr.bf16.mxu0 %v1615_v44  ;;  %909 = vmatmul.mubr.bf16.gmra.mrb[4].mxu1 %v1629_v56 }
  0x96   : > { %1458 = vmatpush3.bf16.msra.mxu1 %v1616_v45  ;;  %1469 = vmatprep.mubr.bf16.mxu1 %v1640_v1 }
  0x97   : > { %1459 = vmatprep.subr.bf16.mxu1 %v1619_v48 }
  0x98   : > { %1412 = vmatpush3.bf16.msra.mxu0 %v1617_v46 }
  0x99   : > { %1413 = vmatprep.subr.bf16.mxu0 %v1618_v47 }
  0x9a   : > { %1460 = vmatpush3.bf16.msra.mxu1 %v1619_v48 }
  0x9b   : > { %1461 = vmatprep.subr.bf16.mxu1 %v1624_v52 }
  0x9c   : > { %1414 = vmatpush3.bf16.msra.mxu0 %v1620_v49 }
  0x9d   : > { %1415 = vmatprep.subr.bf16.mxu0 %v1623_v51 }
  0x9e   : > { %1462 = vmatpush3.bf16.msra.mxu1 %v1624_v52 }
  0x9f   : > { %1463 = vmatprep.subr.bf16.mxu1 %v1631_v58 }
  0xa0   : > { %1416 = vmatpush3.bf16.msra.mxu0 %v1626_v54 }
  0xa1   : > { %1417 = vmatprep.subr.bf16.mxu0 %v1630_v57 }
  0xa2   : > { %1464 = vmatpush3.bf16.msra.mxu1 %v1631_v58 }
  0xa3   : > { %1465 = vmatprep.subr.bf16.mxu1 %v1634_v61 }
  0xa4   : > { %1418 = vmatpush3.bf16.msra.mxu0 %v1632_v59 }
  0xa5   : > { %1419 = vmatprep.subr.bf16.mxu0 %v1633_v60 }
  0xa6   : > { %1466 = vmatpush3.bf16.msra.mxu1 %v1634_v61 }
  0xa7   : > { %1467 = vmatprep.subr.bf16.mxu1 %v1639_v0 }
  0xa8   : > { %1420 = vmatpush3.bf16.msra.mxu0 %v1635_v62 }
  0xa9   : > { %1473 = vmatprep.subr.bf16.mxu0 %v1645_v6 }
  0xaa   : > { %1468 = vmatpush3.bf16.msra.mxu1 %v1639_v0 }
  0xab   : > { %950 = vmatmul.mubr.bf16.vlgmr.msra.gmra.mrb[8].mxu0 %v1636_v2 }
  0xac   : > { %957 = vmatprep.mubr.bf16.mxu0 %v1642_v3  ;;  %1474 = vmatpush3.bf16.msra.mxu0 %v1645_v6 }
  0xad   : > { %1470 = vmatmul.mubr.bf16.vlgmr.msra.gmra.mrb[8].mxu1 %v1641_v4  ;;  %1475 = vmatprep.subr.bf16.mxu0 %v1646_v7 }
  0xb0   : > { %1476 = vmatpush3.bf16.msra.mxu0 %v1646_v7 }
  0xb1   : > { %1477 = vmatprep.subr.bf16.mxu0 %v1647_v8 }
  0xb3   : > { %958 = vmatmul.mubr.bf16.gmra.mrb[12].mxu0 %v1644_v5 }
  0xb4   : > { %1478 = vmatpush3.bf16.msra.mxu0 %v1647_v8 }
  0xb5   : > { %1479 = vmatprep.subr.bf16.mxu0 %v1648_v9 }
  0xb8   : > { %1480 = vmatpush3.bf16.msra.mxu0 %v1648_v9 }
  0xb9   : > { %1481 = vmatprep.subr.bf16.mxu0 %v1649_v10 }
  0xbc   : > { %1482 = vmatpush3.bf16.msra.mxu0 %v1649_v10 }
  0xbd   : > { %1483 = vmatprep.subr.bf16.mxu0 %v1650_v11 }
  0xc0   : > { %1484 = vmatpush3.bf16.msra.mxu0 %v1650_v11 }
  0xc1   : > { %1485 = vmatprep.subr.bf16.mxu0 %v1651_v12 }
  0xc4   : > { %1486 = vmatpush3.bf16.msra.mxu0 %v1651_v12 }
  0xc5   : > { %1487 = vmatprep.subr.bf16.mxu0 %v1652_v13 }
  0xc8   : > { %1488 = vmatpush3.bf16.msra.mxu0 %v1652_v13  ;;  %v1334_v13 = vld [vmem:[%s2112_s4] ss:$0 sm:$0xff] }
 0x15e   : > { %v1365_v14 = vpop.f32.mrb[0].mxu0 }
 0x15f   : > { %v1366_v16 = vpop.f32.mrb[1].mxu0 }
 0x160   : > { %v1367_v17 = vadd.f32 %v1366_v16, %v1365_v14  ;;  %v1368_v18 = vpop.f32.mrb[2].mxu0  ;;  %v1393_v19 = vpop.f32.mrb[0].mxu1 }
 0x161   : > { %v1369_v20 = vpop.f32.mrb[3].mxu0  ;;  %v1394_v23 = vpop.f32.mrb[1].mxu1 }
 0x162   : > { %v854_v21 = vadd.f32 %v1367_v17, %v1263_v15  ;;  %v1370_v22 = vadd.f32 %v1369_v20, %v1368_v18  ;;  %v1395_v24 = vadd.f32 %v1394_v23, %v1393_v19  ;;  %v1396_v25 = vpop.f32.mrb[2].mxu1 }
 0x163   : > { %v1397_v27 = vpop.f32.mrb[3].mxu1 }
 0x164   : > { %v857_v26 = vadd.f32 %v1370_v22, %v1263_v15  ;;  %v903_v28 = vadd.f32 %v1395_v24, %v854_v21  ;;  %v1398_v29 = vadd.f32 %v1397_v27, %v1396_v25 }
 0x166   : > { %v906_v30 = vadd.f32 %v1398_v29, %v857_v26  ;;  %v1371_v31 = vpop.f32.mrb[4].mxu0 }
 0x167   : > { %v1372_v32 = vpop.f32.mrb[5].mxu0 }
 0x168   : > { %v1373_v33 = vadd.f32 %v1372_v32, %v1371_v31  ;;  %v1374_v34 = vpop.f32.mrb[6].mxu0  ;;  %v1399_v35 = vpop.f32.mrb[4].mxu1 }
 0x169   : > { %v1375_v36 = vpop.f32.mrb[7].mxu0  ;;  %v1400_v39 = vpop.f32.mrb[5].mxu1 }
 0x16a   : > { %v862_v37 = vadd.f32 %v1373_v33, %v1263_v15  ;;  %v1376_v38 = vadd.f32 %v1375_v36, %v1374_v34  ;;  %v1401_v40 = vadd.f32 %v1400_v39, %v1399_v35  ;;  %v1402_v41 = vpop.f32.mrb[6].mxu1 }
 0x16b   : > { %v1403_v43 = vpop.f32.mrb[7].mxu1 }
 0x16c   : > { %v865_v42 = vadd.f32 %v1376_v38, %v1263_v15  ;;  %v911_v44 = vadd.f32 %v1401_v40, %v862_v37  ;;  %v1404_v45 = vadd.f32 %v1403_v43, %v1402_v41 }
 0x16e   : > { %v914_v46 = vadd.f32 %v1404_v45, %v865_v42 }
 0x17e   : > { %v1421_v47 = vpop.f32.mrb[8].mxu0 }
 0x17f   : > { %v1422_v48 = vpop.f32.mrb[9].mxu0 }
 0x180   : > { %v1423_v49 = vadd.f32 %v1422_v48, %v1421_v47  ;;  %v1424_v50 = vpop.f32.mrb[10].mxu0  ;;  %v1471_v52 = vpop.f32.mrb[8].mxu1 }
 0x181   : > { %v1425_v51 = vpop.f32.mrb[11].mxu0  ;;  %v1000_v55 = vpop.f32.mrb[9].mxu1 }
 0x182   : > { %v1426_v53 = vadd.f32 %v1425_v51, %v1424_v50  ;;  %v952_v54 = vadd.f32 %v1423_v49, %v903_v28  ;;  %v1472_v56 = vpop.f32.mrb[10].mxu1 }
 0x183   : > { %v1003_v59 = vpop.f32.mrb[11].mxu1 }
 0x184   : > { %v1001_v57 = vadd.f32 %v1000_v55, %v952_v54  ;;  %v955_v58 = vadd.f32 %v1426_v53, %v906_v30 }
 0x186   : > { %v1004_v60 = vadd.f32 %v1003_v59, %v955_v58  ;;  %v1427_v61 = vpop.f32.mrb[12].mxu0  ;;  %v1015_v63 = vmax.f32 %v1001_v57, 0.0 }
 0x187   : > { %v1428_v62 = vpop.f32.mrb[13].mxu0 }
 0x188   : > { %v1016_v0 = vmax.f32 %v1004_v60, 0.0  ;;  %v1429_v1 = vadd.f32 %v1428_v62, %v1427_v61  ;;  %v1430_v2 = vpop.f32.mrb[14].mxu0 }
 0x189   : > { %v1431_v3 = vpop.f32.mrb[15].mxu0 }
 0x18a   : > { %v1019_v4 = vpack.c.bf16 %v1016_v0, %v1015_v63  ;;  %v960_v5 = vadd.f32 %v1429_v1, %v911_v44  ;;  %v1432_v6 = vadd.f32 %v1431_v3, %v1430_v2 }
 0x18c   : > { %v1009_v7 = vadd.f32 %v1471_v52, %v960_v5  ;;  %v963_v8 = vadd.f32 %v1432_v6, %v914_v46  ;;  %1489 = vmatprep.mubr.bf16.mxu0 %v1019_v4 }
 0x18e   : > { %v1012_v9 = vadd.f32 %v1472_v56, %v963_v8  ;;  %v1017_v10 = vmax.f32 %v1009_v7, 0.0 }
 0x190   : > { %v1018_v11 = vmax.f32 %v1012_v9, 0.0 }
 0x192   : > { %v1020_v12 = vpack.c.bf16 %v1018_v11, %v1017_v10 }
 0x194   : > { %1490 = vmatmul.mubr.bf16.vlgmr.msra.gmra.mrb[16].mxu0 %v1020_v12 }
 0x267   : > { %v1491_v14 = vpop.f32.mrb[16].mxu0 }
 0x268   : > { %v1135_v15 = vadd.f32 %v1491_v14, %v1334_v13  ;;  %v1126_v16 = vpop.f32.mrb[17].mxu0 }
 0x269   : > { %v1127_v17 = vadd.f32 %v1334_v13, %v1126_v16  ;;  %v1492_v18 = vpop.f32.mrb[18].mxu0 }
 0x26a   : > { %1143 = vst [vmem:[%s272_s28 + $0x10] sm:$0xff] %v1135_v15  ;;  %v1138_v19 = vadd.f32 %v1492_v18, %v1334_v13  ;;  %v1129_v20 = vpop.f32.mrb[19].mxu0 }
 0x26b   : > { %1141 = vst [vmem:[%s272_s28] sm:$0xff] %v1127_v17  ;;  %v1130_v21 = vadd.f32 %v1334_v13, %v1129_v20 }
 0x26c   : > { %1144 = vst [vmem:[%s272_s28 + $0x18] sm:$0xff] %v1138_v19 }
 0x26d   : > { %1142 = vst [vmem:[%s272_s28 + $0x8] sm:$0xff] %v1130_v21 }
 0x26e   : > { %1752 = shalt.err (!%p1749_p2)
}
 0x26f   : > { %s1753_s24 = scalar_lea.hbm %s2064_s12, 512  ;;  %s1757_s9 = scalar_lea.hbm %s2113_s5, 1024 }
 0x270   : > { %p1754_p13 = scmp.ne.s32.totalorder %s2064_s12, %s1753_s24  ;;  %p1758_p4 = scmp.lt.u32.totalorder %s2064_s12, %s2113_s5 }
 0x271   : > { %p1759_p5 = scmp.lt.u32.totalorder %s1757_s9, %s1753_s24  ;;  %p1761_p11 = scmp.lt.u32.totalorder %s1753_s24, %s2064_s12 }
 0x272   : > { %p1755_p6 = pnand %p1754_p13, %p2127_p0 }
 0x273   : > { %p1760_p8 = por %p1759_p5, %p1758_p4 }
 0x274   : > { %p1756_p10 = pneg %p1755_p6 }
 0x275   : > { %p1762_p1 = por %p1761_p11, %p1760_p8 }
 0x277   : > { %p1763_p3 = pnand %p1762_p1, %p1756_p10 }
 0x279   : > { %1766 = shalt.err (!%p1763_p3)
}
 0x27a   : > { %s1819_s7 = smov 128   ;;  %s1820_s8 = smov 8  }
 0x27b   : > { %1506 = dma.vmem_to_hbm [thread:$0]  (%p2127_p0), %s2059_s30, 512, %s2064_s12, %s1146_s22, %s1819_s7, %s1819_s7, %s1820_s8  }
 0x27c PF: > { %s1174_s10 = sand.u32 1, %s1797_s18   ;;  %p2128_p7 = scmp.ne.s32.totalorder %s2118_s25, 0 }
 0x27d   : > { %p2129_p9 = scmp.ge.s32.totalorder %s1809_s21, 2  ;;  %s1175_s13 = scalar_lea.sflag [#allocation4], %s1174_s10 }
 0x27f   : > { %p1520_p12 = pnand %p2129_p9, %p2128_p7 }
 0x281   : > { %1792 = dma.done.wait (!%p1520_p12), %s1175_s13, 512  }
 0x282   : > { %1794 = vsyncadd (!%p1520_p12), %s1175_s13, 4294966784  ;;  %p19_p2 = scmp.ge.s32.totalorder %s1961_s14, 4   ;;  %s2130_s18 = smov %s1801_s19 }
 0x283   : > { %s2131_s19 = smov %s1805_s20  ;;  %s2132_s20 = smov %s1977_s27 }
 0x284   : > { %s2133_s21 = smov %s1961_s14  ;;  %21 = sbr.rel (!%p19_p2) target bundleno = 6 (0x6), region = 93 }
 0x28b   :  { %1180 = vsyncpa [#allocation3], 1 }
 0x28c   :  { %1182 = vsyncpa [#allocation3 + $0x1], 1 }
 0x28d   :  { %1183 = vsyncpa [#allocation6], 1 }
 0x28e   :  { %1184 = vsyncpa [#allocation4], 1 }
 0x28f   :  { %1186 = vsyncpa [#allocation4 + $0x1], 1 }

</bundles_post_ra>
